<compile_context>
chip_gen: v7x
topology: tpu7x:2x2x1
jax: 0.10.0
libtpu: 0.0.40
codegen_flags: <defaults>
</compile_context>

<pallas_src>
import functools

import numpy as np
import jax
import jax.numpy as jnp
from jax.experimental import pallas as pl
from jax.experimental.pallas import tpu as pltpu


def _round_up(v, m):
    return ((v + m - 1) // m) * m


def _concrete_dropout_conv_kernel(x_ref, z_ref, w_ref, b_ref, out_ref,
                                  xpad_ref, *, img_w, img_s, pad):
    """Fused concrete-dropout + 3x3 'same' conv for a block of B images.

    x_ref    : VMEM (1, B*C, S) f32   flat NCHW images (S = H*W), B stacked rows
    z_ref    : VMEM (1, B*C, S) f32   pre-fused noise logits  drop_logit / tmp
    w_ref    : VMEM (9, B*Cout, B*C) f32  per-tap block-diag weights * 1/(1-p)
    b_ref    : VMEM (B*Cout, 1) f32
    out_ref  : VMEM (1, B*Cout, S) f32
    xpad_ref : VMEM (B*C, S + 2*pad) f32 scratch (zero halo = 'same' row pad)
    """
    rows = x_ref.shape[1]                       # B*C (static)

    x = x_ref[0]                                # (B*C, S)
    z = z_ref[0]                                # (B*C, S)

    # keep_prob = 1 - sigmoid(z) = 1 / (1 + exp(z)); saturates to 0/1, no NaN.
    keep = 1.0 / (1.0 + jnp.exp(z))
    xd = x * keep                               # 1/(1-p) is folded into w_ref

    # ---- zero-haloed flat image (handles the +/-1 row taps' 'same' padding).
    # Margins are re-zeroed every grid step: the scratch is per-core and the
    # grid axis is "parallel", so a program_id==0 guard would be wrong.
    zero_margin = jnp.zeros((rows, pad), jnp.float32)
    xpad_ref[:, 0:pad] = zero_margin
    xpad_ref[:, pad + img_s:pad + img_s + pad] = zero_margin
    xpad_ref[:, pad:pad + img_s] = xd

    # Column masks kill the row wrap-around of the +/-1 column taps.
    col = jax.lax.broadcasted_iota(jnp.int32, (1, img_s), 1) % img_w
    mask_l = jnp.where(col > 0, 1.0, 0.0)             # dw=-1 invalid at w==0
    mask_r = jnp.where(col < (img_w - 1), 1.0, 0.0)   # dw=+1 invalid at w==W-1

    # ---- conv = 9 accumulating MXU matmuls, no patches buffer.
    acc = None
    tap = 0
    for kh in range(3):
        for kw in range(3):
            start = pad + (kh - 1) * img_w + (kw - 1)
            xs = xpad_ref[:, start:start + img_s]      # (B*C, S) shifted view
            if kw == 0:
                xs = xs * mask_l
            elif kw == 2:
                xs = xs * mask_r
            t = jnp.dot(w_ref[tap], xs, preferred_element_type=jnp.float32)
            acc = t if acc is None else acc + t
            tap += 1

    out_ref[0] = acc + b_ref[...]                      # lane-dense (B*Cout, S)


def concrete_dropout_conv_forward(x_nchw, p_logit, conv_w, conv_b, rng_key,
                                  weight_regulariser, dropout_regulariser,
                                  batch_block=2):
    """Forward of ConcreteDropout(x, layer=Conv2d(C, Cout, 3, padding=1)).

    Returns (output_NCHW, regularisation_scalar).
    """
    n, c, h, w = x_nchw.shape
    cout, cin, kh, kw = conv_w.shape
    assert cin == c and kh == 3 and kw == 3
    s = h * w
    pad = _round_up(w + 1, 128)          # lane-aligned halo, >= one row + 1

    bb = batch_block if (n % batch_block == 0) else 1
    g = n // bb                          # grid length (keep >=2 on v7x if possible)

    eps = 1e-7
    tmp = 0.1

    p = jax.nn.sigmoid(p_logit.astype(jnp.float32).reshape(()))
    inv_retain = 1.0 / (1.0 - p)

    # Pre-fused noise logits: fused by XLA into the RNG op, same HBM bytes as u.
    u = jax.random.uniform(rng_key, (n, c, s), jnp.float32)
    log_odds_p = jnp.log(p + eps) - jnp.log(1.0 - p + eps)
    z = ((log_odds_p + jnp.log(u + eps) - jnp.log(1.0 - u + eps)) / tmp
         ).astype(jnp.float32)

    x_flat = x_nchw.astype(jnp.float32).reshape(n, c, s)      # free reshape

    # Free row-major reshapes: (n, C, S) == (n/B, B*C, S).
    x_blk = x_flat.reshape(g, bb * c, s)
    z_blk = z.reshape(g, bb * c, s)

    # torch conv weight (Cout, C, 3, 3) -> 9 block-diagonal tap matrices
    # (B*Cout, B*C), with the 1/(1-p) retain scale folded in (layer is linear).
    w_f32 = conv_w.astype(jnp.float32)
    w_taps = jnp.transpose(w_f32, (2, 3, 0, 1)).reshape(9, cout, c)
    eye_b = jnp.eye(bb, dtype=jnp.float32)
    w_big = (jnp.einsum('ab,tij->taibj', eye_b, w_taps)
             .reshape(9, bb * cout, bb * c)) * inv_retain
    b_big = jnp.tile(conv_b.astype(jnp.float32), bb).reshape(bb * cout, 1)

    # Regularisation: pure function of (w, b, p); computed once in the wrapper.
    sum_sq = jnp.sum(w_f32 * w_f32) + jnp.sum(conv_b.astype(jnp.float32) ** 2)
    weights_reg = weight_regulariser * sum_sq * inv_retain
    dropout_reg = ((p * jnp.log(p) + (1.0 - p) * jnp.log(1.0 - p))
                   * (dropout_regulariser * c * h * w))
    reg = weights_reg + dropout_reg

    kernel = functools.partial(_concrete_dropout_conv_kernel,
                               img_w=w, img_s=s, pad=pad)

    cost = pl.CostEstimate(
        flops=2 * n * s * cout * 9 * c + 6 * n * c * s,
        transcendentals=n * c * s,
        bytes_accessed=4 * (2 * n * c * s + n * cout * s
                            + 9 * bb * cout * bb * c + bb * cout),
    )

    out_blk = pl.pallas_call(
        kernel,
        grid=(g,),
        out_shape=jax.ShapeDtypeStruct((g, bb * cout, s), jnp.float32),
        in_specs=[
            pl.BlockSpec((1, bb * c, s), lambda i: (i, 0, 0)),        # x
            pl.BlockSpec((1, bb * c, s), lambda i: (i, 0, 0)),        # noise z
            pl.BlockSpec((9, bb * cout, bb * c), lambda i: (0, 0, 0)),  # weights
            pl.BlockSpec((bb * cout, 1), lambda i: (0, 0)),           # bias
        ],
        out_specs=pl.BlockSpec((1, bb * cout, s), lambda i: (i, 0, 0)),
        scratch_shapes=[
            pltpu.VMEM((bb * c, s + 2 * pad), jnp.float32),           # halo img
        ],
        compiler_params=pltpu.CompilerParams(
            dimension_semantics=("parallel",)),
        cost_estimate=cost,
    )(x_blk, z_blk, w_big, b_big)

    out_nchw = out_blk.reshape(n, cout, h, w)                         # free
    return out_nchw, reg


def _reference_forward(x_nchw, p_logit, conv_w, conv_b, u_flat,
                       weight_regulariser, dropout_regulariser):
    """Pure-JAX mirror of the torch module, used only for the self-check."""
    eps = 1e-7
    tmp = 0.1
    n, c, h, w = x_nchw.shape
    p = jax.nn.sigmoid(p_logit.reshape(()))
    u = u_flat.reshape(n, c, h, w)
    drop_logit = (jnp.log(p + eps) - jnp.log(1.0 - p + eps)
                  + jnp.log(u + eps) - jnp.log(1.0 - u + eps))
    drop_prob = jax.nn.sigmoid(drop_logit / tmp)
    xd = x_nchw * (1.0 - drop_prob) / (1.0 - p)
    out = jax.lax.conv_general_dilated(
        xd, conv_w, window_strides=(1, 1), padding="SAME",
        dimension_numbers=("NCHW", "OIHW", "NCHW")) + conv_b.reshape(1, -1, 1, 1)
    sum_sq = jnp.sum(conv_w ** 2) + jnp.sum(conv_b ** 2)
    weights_reg = weight_regulariser * sum_sq / (1.0 - p)
    dropout_reg = ((p * jnp.log(p) + (1.0 - p) * jnp.log(1.0 - p))
                   * (dropout_regulariser * c * h * w))
    return out, weights_reg + dropout_reg


if __name__ == "__main__":
    key = jax.random.PRNGKey(0)
    kx, kw_, kb, knoise = jax.random.split(key, 4)

    N, C, H, W = 2, 4, 16, 16
    Cout = 8

    x = jax.random.normal(kx, (N, C, H, W), jnp.float32)
    conv_w = 0.1 * jax.random.normal(kw_, (Cout, C, 3, 3), jnp.float32)
    conv_b = 0.1 * jax.random.normal(kb, (Cout,), jnp.float32)
    # init_min = init_max = 0.1  ->  p_logit = log(0.1) - log(0.9) exactly
    init = 0.1
    p_logit = jnp.full((1,), np.log(init) - np.log(1.0 - init), jnp.float32)

    weight_regulariser = 1e-6
    dropout_regulariser = 1e-5

    out, reg = concrete_dropout_conv_forward(
        x, p_logit, conv_w, conv_b, knoise,
        weight_regulariser, dropout_regulariser)
    jax.block_until_ready((out, reg))

    assert out.shape == (N, Cout, H, W)
    assert reg.shape == ()

    # Self-check against a pure-JAX reference using the same noise draw.
    u_same = jax.random.uniform(knoise, (N, C, H * W), jnp.float32)
    ref_out, ref_reg = _reference_forward(
        x, p_logit, conv_w, conv_b, u_same,
        weight_regulariser, dropout_regulariser)
    np.testing.assert_allclose(np.asarray(out), np.asarray(ref_out),
                               rtol=1e-3, atol=1e-3)
    np.testing.assert_allclose(float(reg), float(ref_reg),
                               rtol=1e-3, atol=1e-5)

    print("KERNEL_OK")
</pallas_src>

<mosaic_0001>
module attributes {stable_mosaic.version = 11 : i64} {
  func.func @_concrete_dropout_conv_kernel(%arg0: i32, %arg1: memref<1x8x256xf32, #tpu.memory_space<vmem>>, %arg2: memref<1x8x256xf32, #tpu.memory_space<vmem>>, %arg3: memref<9x16x8xf32, #tpu.memory_space<vmem>>, %arg4: memref<16x1xf32, #tpu.memory_space<vmem>>, %arg5: memref<1x16x256xf32, #tpu.memory_space<vmem>>, %arg6: memref<8x512xf32, #tpu.memory_space<vmem>>) attributes {dimension_semantics = [#tpu.dimension_semantics<parallel>], iteration_bounds = array<i64: 1>, scalar_prefetch = 0 : i64, scratch_operands = 1 : i64, tpu.core_type = #tpu.core_type<tc>, window_params = [{transform_indices = @transform_0, window_bounds = array<i64: 1, 8, 256>}, {transform_indices = @transform_1, window_bounds = array<i64: 1, 8, 256>}, {pipeline_mode = #tpu.pipeline_mode<synchronous>, transform_indices = @transform_2, window_bounds = array<i64: 9, 16, 8>}, {pipeline_mode = #tpu.pipeline_mode<synchronous>, transform_indices = @transform_3, window_bounds = array<i64: 16, 1>}, {transform_indices = @transform_4, window_bounds = array<i64: 1, 16, 256>}]} {
    %c0 = arith.constant 0 : index
    %c0_0 = arith.constant 0 : index
    %c0_1 = arith.constant 0 : index
    %0 = vector.load %arg1[%c0, %c0_0, %c0_1] : memref<1x8x256xf32, #tpu.memory_space<vmem>>, vector<1x8x256xf32>
    %1 = vector.shape_cast %0 : vector<1x8x256xf32> to vector<8x256xf32>
    %c0_2 = arith.constant 0 : index
    %c0_3 = arith.constant 0 : index
    %c0_4 = arith.constant 0 : index
    %2 = vector.load %arg2[%c0_2, %c0_3, %c0_4] : memref<1x8x256xf32, #tpu.memory_space<vmem>>, vector<1x8x256xf32>
    %3 = vector.shape_cast %2 : vector<1x8x256xf32> to vector<8x256xf32>
    %4 = math.exp %3 : vector<8x256xf32>
    %cst = arith.constant 1.000000e+00 : f32
    %5 = vector.broadcast %cst : f32 to vector<8x256xf32>
    %6 = arith.addf %5, %4 : vector<8x256xf32>
    %cst_5 = arith.constant 1.000000e+00 : f32
    %7 = vector.broadcast %cst_5 : f32 to vector<8x256xf32>
    %8 = arith.divf %7, %6 : vector<8x256xf32>
    %9 = arith.mulf %1, %8 : vector<8x256xf32>
    %cst_6 = arith.constant 0.000000e+00 : f32
    %10 = vector.broadcast %cst_6 : f32 to vector<8x128xf32>
    %c0_7 = arith.constant 0 : index
    %c0_8 = arith.constant 0 : index
    %11 = vector.load %arg6[%c0_7, %c0_8] : memref<8x512xf32, #tpu.memory_space<vmem>>, vector<8x128xf32>
    tpu.vector_store %arg6[%c0_7, %c0_8], %10 {strides = array<i32>} : memref<8x512xf32, #tpu.memory_space<vmem>>, vector<8x128xf32>,
    %c0_9 = arith.constant 0 : index
    %c384 = arith.constant 384 : index
    %12 = vector.load %arg6[%c0_9, %c384] : memref<8x512xf32, #tpu.memory_space<vmem>>, vector<8x128xf32>
    tpu.vector_store %arg6[%c0_9, %c384], %10 {strides = array<i32>} : memref<8x512xf32, #tpu.memory_space<vmem>>, vector<8x128xf32>,
    %c0_10 = arith.constant 0 : index
    %c128 = arith.constant 128 : index
    %13 = vector.load %arg6[%c0_10, %c128] : memref<8x512xf32, #tpu.memory_space<vmem>>, vector<8x256xf32>
    tpu.vector_store %arg6[%c0_10, %c128], %9 {strides = array<i32>} : memref<8x512xf32, #tpu.memory_space<vmem>>, vector<8x256xf32>,
    %14 = tpu.iota {dimensions = array<i32: 1>} : vector<1x256xi32>
    %c16_i32 = arith.constant 16 : i32
    %c0_i32 = arith.constant 0 : i32
    %15 = arith.cmpi eq, %c16_i32, %c0_i32 : i32
    %c1_i32 = arith.constant 1 : i32
    %16 = arith.select %15, %c1_i32, %c16_i32 : i32
    %17 = vector.broadcast %16 : i32 to vector<1x256xi32>
    %18 = arith.remsi %14, %17 : vector<1x256xi32>
    %c0_i32_11 = arith.constant 0 : i32
    %19 = vector.broadcast %c0_i32_11 : i32 to vector<1x256xi32>
    %20 = arith.cmpi ne, %18, %19 : vector<1x256xi32>
    %c0_i32_12 = arith.constant 0 : i32
    %21 = vector.broadcast %c0_i32_12 : i32 to vector<1x256xi32>
    %22 = arith.cmpi slt, %18, %21 : vector<1x256xi32>
    %c0_i32_13 = arith.constant 0 : i32
    %23 = arith.cmpi slt, %16, %c0_i32_13 : i32
    %24 = vector.broadcast %23 : i1 to vector<1x256xi1>
    %25 = vector.broadcast %24 : vector<1x256xi1> to vector<1x256xi1>
    %26 = arith.xori %22, %25 : vector<1x256xi1>
    %27 = arith.andi %26, %20 : vector<1x256xi1>
    %28 = vector.broadcast %16 : i32 to vector<1x256xi32>
    %29 = arith.addi %18, %28 : vector<1x256xi32>
    %30 = arith.select %27, %29, %18 : vector<1x256xi1>, vector<1x256xi32>
    %c0_i32_14 = arith.constant 0 : i32
    %31 = vector.broadcast %c0_i32_14 : i32 to vector<1x256xi32>
    %32 = arith.cmpi sgt, %30, %31 : vector<1x256xi32>
    %cst_15 = arith.constant 1.000000e+00 : f32
    %cst_16 = arith.constant 0.000000e+00 : f32
    %33 = vector.broadcast %cst_15 : f32 to vector<1x256xf32>
    %34 = vector.broadcast %cst_16 : f32 to vector<1x256xf32>
    %35 = arith.select %32, %33, %34 : vector<1x256xi1>, vector<1x256xf32>
    %c15_i32 = arith.constant 15 : i32
    %36 = vector.broadcast %c15_i32 : i32 to vector<1x256xi32>
    %37 = arith.cmpi slt, %30, %36 : vector<1x256xi32>
    %cst_17 = arith.constant 1.000000e+00 : f32
    %cst_18 = arith.constant 0.000000e+00 : f32
    %38 = vector.broadcast %cst_17 : f32 to vector<1x256xf32>
    %39 = vector.broadcast %cst_18 : f32 to vector<1x256xf32>
    %40 = arith.select %37, %38, %39 : vector<1x256xi1>, vector<1x256xf32>
    %c0_19 = arith.constant 0 : index
    %c111 = arith.constant 111 : index
    %41 = vector.load %arg6[%c0_19, %c111] : memref<8x512xf32, #tpu.memory_space<vmem>>, vector<8x256xf32>
    %42 = vector.broadcast %35 : vector<1x256xf32> to vector<8x256xf32>
    %43 = arith.mulf %41, %42 : vector<8x256xf32>
    %c0_20 = arith.constant 0 : index
    %c0_21 = arith.constant 0 : index
    %c0_22 = arith.constant 0 : index
    %44 = vector.load %arg3[%c0_20, %c0_21, %c0_22] : memref<9x16x8xf32, #tpu.memory_space<vmem>>, vector<1x16x8xf32>
    %45 = vector.shape_cast %44 : vector<1x16x8xf32> to vector<16x8xf32>
    %cst_23 = arith.constant dense<0.000000e+00> : vector<16x256xf32>
    %46 = tpu.matmul %45, %43, %cst_23 {dimension_numbers = #tpu.dot_dimension_numbers<[1], [0], [0], [1], [0, 0, 1, 1], [], []>} : vector<16x8xf32>, vector<8x256xf32>, vector<16x256xf32> -> vector<16x256xf32>
    %c0_24 = arith.constant 0 : index
    %c112 = arith.constant 112 : index
    %47 = vector.load %arg6[%c0_24, %c112] : memref<8x512xf32, #tpu.memory_space<vmem>>, vector<8x256xf32>
    %c1 = arith.constant 1 : index
    %c0_25 = arith.constant 0 : index
    %c0_26 = arith.constant 0 : index
    %48 = vector.load %arg3[%c1, %c0_25, %c0_26] : memref<9x16x8xf32, #tpu.memory_space<vmem>>, vector<1x16x8xf32>
    %49 = vector.shape_cast %48 : vector<1x16x8xf32> to vector<16x8xf32>
    %cst_27 = arith.constant dense<0.000000e+00> : vector<16x256xf32>
    %50 = tpu.matmul %49, %47, %cst_27 {dimension_numbers = #tpu.dot_dimension_numbers<[1], [0], [0], [1], [0, 0, 1, 1], [], []>} : vector<16x8xf32>, vector<8x256xf32>, vector<16x256xf32> -> vector<16x256xf32>
    %51 = arith.addf %46, %50 : vector<16x256xf32>
    %c0_28 = arith.constant 0 : index
    %c113 = arith.constant 113 : index
    %52 = vector.load %arg6[%c0_28, %c113] : memref<8x512xf32, #tpu.memory_space<vmem>>, vector<8x256xf32>
    %53 = vector.broadcast %40 : vector<1x256xf32> to vector<8x256xf32>
    %54 = arith.mulf %52, %53 : vector<8x256xf32>
    %c2 = arith.constant 2 : index
    %c0_29 = arith.constant 0 : index
    %c0_30 = arith.constant 0 : index
    %55 = vector.load %arg3[%c2, %c0_29, %c0_30] : memref<9x16x8xf32, #tpu.memory_space<vmem>>, vector<1x16x8xf32>
    %56 = vector.shape_cast %55 : vector<1x16x8xf32> to vector<16x8xf32>
    %cst_31 = arith.constant dense<0.000000e+00> : vector<16x256xf32>
    %57 = tpu.matmul %56, %54, %cst_31 {dimension_numbers = #tpu.dot_dimension_numbers<[1], [0], [0], [1], [0, 0, 1, 1], [], []>} : vector<16x8xf32>, vector<8x256xf32>, vector<16x256xf32> -> vector<16x256xf32>
    %58 = arith.addf %51, %57 : vector<16x256xf32>
    %c0_32 = arith.constant 0 : index
    %c127 = arith.constant 127 : index
    %59 = vector.load %arg6[%c0_32, %c127] : memref<8x512xf32, #tpu.memory_space<vmem>>, vector<8x256xf32>
    %60 = vector.broadcast %35 : vector<1x256xf32> to vector<8x256xf32>
    %61 = arith.mulf %59, %60 : vector<8x256xf32>
    %c3 = arith.constant 3 : index
    %c0_33 = arith.constant 0 : index
    %c0_34 = arith.constant 0 : index
    %62 = vector.load %arg3[%c3, %c0_33, %c0_34] : memref<9x16x8xf32, #tpu.memory_space<vmem>>, vector<1x16x8xf32>
    %63 = vector.shape_cast %62 : vector<1x16x8xf32> to vector<16x8xf32>
    %cst_35 = arith.constant dense<0.000000e+00> : vector<16x256xf32>
    %64 = tpu.matmul %63, %61, %cst_35 {dimension_numbers = #tpu.dot_dimension_numbers<[1], [0], [0], [1], [0, 0, 1, 1], [], []>} : vector<16x8xf32>, vector<8x256xf32>, vector<16x256xf32> -> vector<16x256xf32>
    %65 = arith.addf %58, %64 : vector<16x256xf32>
    %c0_36 = arith.constant 0 : index
    %c128_37 = arith.constant 128 : index
    %66 = vector.load %arg6[%c0_36, %c128_37] : memref<8x512xf32, #tpu.memory_space<vmem>>, vector<8x256xf32>
    %c4 = arith.constant 4 : index
    %c0_38 = arith.constant 0 : index
    %c0_39 = arith.constant 0 : index
    %67 = vector.load %arg3[%c4, %c0_38, %c0_39] : memref<9x16x8xf32, #tpu.memory_space<vmem>>, vector<1x16x8xf32>
    %68 = vector.shape_cast %67 : vector<1x16x8xf32> to vector<16x8xf32>
    %cst_40 = arith.constant dense<0.000000e+00> : vector<16x256xf32>
    %69 = tpu.matmul %68, %66, %cst_40 {dimension_numbers = #tpu.dot_dimension_numbers<[1], [0], [0], [1], [0, 0, 1, 1], [], []>} : vector<16x8xf32>, vector<8x256xf32>, vector<16x256xf32> -> vector<16x256xf32>
    %70 = arith.addf %65, %69 : vector<16x256xf32>
    %c0_41 = arith.constant 0 : index
    %c129 = arith.constant 129 : index
    %71 = vector.load %arg6[%c0_41, %c129] : memref<8x512xf32, #tpu.memory_space<vmem>>, vector<8x256xf32>
    %72 = vector.broadcast %40 : vector<1x256xf32> to vector<8x256xf32>
    %73 = arith.mulf %71, %72 : vector<8x256xf32>
    %c5 = arith.constant 5 : index
    %c0_42 = arith.constant 0 : index
    %c0_43 = arith.constant 0 : index
    %74 = vector.load %arg3[%c5, %c0_42, %c0_43] : memref<9x16x8xf32, #tpu.memory_space<vmem>>, vector<1x16x8xf32>
    %75 = vector.shape_cast %74 : vector<1x16x8xf32> to vector<16x8xf32>
    %cst_44 = arith.constant dense<0.000000e+00> : vector<16x256xf32>
    %76 = tpu.matmul %75, %73, %cst_44 {dimension_numbers = #tpu.dot_dimension_numbers<[1], [0], [0], [1], [0, 0, 1, 1], [], []>} : vector<16x8xf32>, vector<8x256xf32>, vector<16x256xf32> -> vector<16x256xf32>
    %77 = arith.addf %70, %76 : vector<16x256xf32>
    %c0_45 = arith.constant 0 : index
    %c143 = arith.constant 143 : index
    %78 = vector.load %arg6[%c0_45, %c143] : memref<8x512xf32, #tpu.memory_space<vmem>>, vector<8x256xf32>
    %79 = vector.broadcast %35 : vector<1x256xf32> to vector<8x256xf32>
    %80 = arith.mulf %78, %79 : vector<8x256xf32>
    %c6 = arith.constant 6 : index
    %c0_46 = arith.constant 0 : index
    %c0_47 = arith.constant 0 : index
    %81 = vector.load %arg3[%c6, %c0_46, %c0_47] : memref<9x16x8xf32, #tpu.memory_space<vmem>>, vector<1x16x8xf32>
    %82 = vector.shape_cast %81 : vector<1x16x8xf32> to vector<16x8xf32>
    %cst_48 = arith.constant dense<0.000000e+00> : vector<16x256xf32>
    %83 = tpu.matmul %82, %80, %cst_48 {dimension_numbers = #tpu.dot_dimension_numbers<[1], [0], [0], [1], [0, 0, 1, 1], [], []>} : vector<16x8xf32>, vector<8x256xf32>, vector<16x256xf32> -> vector<16x256xf32>
    %84 = arith.addf %77, %83 : vector<16x256xf32>
    %c0_49 = arith.constant 0 : index
    %c144 = arith.constant 144 : index
    %85 = vector.load %arg6[%c0_49, %c144] : memref<8x512xf32, #tpu.memory_space<vmem>>, vector<8x256xf32>
    %c7 = arith.constant 7 : index
    %c0_50 = arith.constant 0 : index
    %c0_51 = arith.constant 0 : index
    %86 = vector.load %arg3[%c7, %c0_50, %c0_51] : memref<9x16x8xf32, #tpu.memory_space<vmem>>, vector<1x16x8xf32>
    %87 = vector.shape_cast %86 : vector<1x16x8xf32> to vector<16x8xf32>
    %cst_52 = arith.constant dense<0.000000e+00> : vector<16x256xf32>
    %88 = tpu.matmul %87, %85, %cst_52 {dimension_numbers = #tpu.dot_dimension_numbers<[1], [0], [0], [1], [0, 0, 1, 1], [], []>} : vector<16x8xf32>, vector<8x256xf32>, vector<16x256xf32> -> vector<16x256xf32>
    %89 = arith.addf %84, %88 : vector<16x256xf32>
    %c0_53 = arith.constant 0 : index
    %c145 = arith.constant 145 : index
    %90 = vector.load %arg6[%c0_53, %c145] : memref<8x512xf32, #tpu.memory_space<vmem>>, vector<8x256xf32>
    %91 = vector.broadcast %40 : vector<1x256xf32> to vector<8x256xf32>
    %92 = arith.mulf %90, %91 : vector<8x256xf32>
    %c8 = arith.constant 8 : index
    %c0_54 = arith.constant 0 : index
    %c0_55 = arith.constant 0 : index
    %93 = vector.load %arg3[%c8, %c0_54, %c0_55] : memref<9x16x8xf32, #tpu.memory_space<vmem>>, vector<1x16x8xf32>
    %94 = vector.shape_cast %93 : vector<1x16x8xf32> to vector<16x8xf32>
    %cst_56 = arith.constant dense<0.000000e+00> : vector<16x256xf32>
    %95 = tpu.matmul %94, %92, %cst_56 {dimension_numbers = #tpu.dot_dimension_numbers<[1], [0], [0], [1], [0, 0, 1, 1], [], []>} : vector<16x8xf32>, vector<8x256xf32>, vector<16x256xf32> -> vector<16x256xf32>
    %96 = arith.addf %89, %95 : vector<16x256xf32>
    %c0_57 = arith.constant 0 : index
    %c0_58 = arith.constant 0 : index
    %97 = vector.load %arg4[%c0_57, %c0_58] : memref<16x1xf32, #tpu.memory_space<vmem>>, vector<16x1xf32>
    %98 = vector.broadcast %97 : vector<16x1xf32> to vector<16x256xf32>
    %99 = arith.addf %96, %98 : vector<16x256xf32>
    %c0_59 = arith.constant 0 : index
    %c0_60 = arith.constant 0 : index
    %c0_61 = arith.constant 0 : index
    %100 = vector.load %arg5[%c0_59, %c0_60, %c0_61] : memref<1x16x256xf32, #tpu.memory_space<vmem>>, vector<1x16x256xf32>
    %101 = vector.shape_cast %100 : vector<1x16x256xf32> to vector<16x256xf32>
    %102 = vector.shape_cast %99 : vector<16x256xf32> to vector<1x16x256xf32>
    tpu.vector_store %arg5[%c0_59, %c0_60, %c0_61], %102 {strides = array<i32>} : memref<1x16x256xf32, #tpu.memory_space<vmem>>, vector<1x16x256xf32>,
    return
  }
  func.func @transform_0(%arg0: i32) -> (i32, i32, i32) {
    %c0_i32 = arith.constant 0 : i32
    %c0_i32_0 = arith.constant 0 : i32
    %c0_i32_1 = arith.constant 0 : i32
    return %arg0, %c0_i32, %c0_i32_0 : i32, i32, i32
  }
  func.func @transform_1(%arg0: i32) -> (i32, i32, i32) {
    %c0_i32 = arith.constant 0 : i32
    %c0_i32_0 = arith.constant 0 : i32
    %c0_i32_1 = arith.constant 0 : i32
    return %arg0, %c0_i32, %c0_i32_0 : i32, i32, i32
  }
  func.func @transform_2(%arg0: i32) -> (i32, i32, i32) {
    %c0_i32 = arith.constant 0 : i32
    %c0_i32_0 = arith.constant 0 : i32
    %c0_i32_1 = arith.constant 0 : i32
    %c0_i32_2 = arith.constant 0 : i32
    return %c0_i32, %c0_i32_0, %c0_i32_1 : i32, i32, i32
  }
  func.func @transform_3(%arg0: i32) -> (i32, i32) {
    %c0_i32 = arith.constant 0 : i32
    %c0_i32_0 = arith.constant 0 : i32
    %c0_i32_1 = arith.constant 0 : i32
    return %c0_i32, %c0_i32_0 : i32, i32
  }
  func.func @transform_4(%arg0: i32) -> (i32, i32, i32) {
    %c0_i32 = arith.constant 0 : i32
    %c0_i32_0 = arith.constant 0 : i32
    %c0_i32_1 = arith.constant 0 : i32
    return %arg0, %c0_i32, %c0_i32_0 : i32, i32, i32
  }
}

</mosaic_0001>

<bundles_post_ra>
// kernel: tpu_custom_call.1
= control target key start
LH: loop header
LB: loop body
LE: loop exit
PB: predicated region body
PF: predicated region fallthrough
CT: control target
= control target key end

     0   :  { %v38_v0 = vlaneseq  ;;  %v1243_v4 = vmov 0.0   ;;  %s1478_s0 = inlined_call_operand.vmem [shape: f32[1,8,256], index: 0, kind: input, shape index: {}]   ;;  %s1479_s1 = inlined_call_operand.vmem [shape: f32[1,8,256], index: 1, kind: input, shape index: {}]   ;;  %s1480_s2 = inlined_call_operand.vmem [shape: f32[9,16,8], index: 2, kind: input, shape index: {}]   ;;  %s1481_s3 = inlined_call_operand.vmem [shape: f32[16,1], index: 3, kind: input, shape index: {}]   ;;  %s1482_s4 = inlined_call_operand.hbm [shape: f32[1,16,256], index: 4, kind: output, shape index: {}]  }
   0x1   :  { %v21_v1 = vld [vmem:[%s1479_s1 + $0x8] sm:$0xff]  ;;  %v20_v3 = vld [vmem:[%s1479_s1] sm:$0xff]  ;;  %180 = vmatprep.mubr.f32.mxu1 %v1243_v4  ;;  %597 = vmatprep.mubr.f32.mxu0 %v1243_v4 }
   0x2   :  { %v24_v2 = vmul.f32 1.442695, %v21_v1  ;;  %v39_v5 = vand.u32 127, %v38_v0  ;;  %v22_v6 = vmul.f32 1.442695, %v20_v3 }
   0x4   :  { %1211 = vpow2.f32 %v24_v2 }
   0x5   :  { %9 = vsyncpa [#allocation4], 0  ;;  %v40_v7 = vadd.s32 128, %v39_v5  ;;  %v45_v8 = vand.u32 15, %v39_v5  ;;  %1213 = vpow2.f32 %v22_v6  ;;  %s1244_s1 = smov 111   ;;  %s1245_s19 = smov 113  }
   0x6   :  { %s1246_s20 = smov 1   ;;  %s1247_s21 = smov 15   ;;  %v19_v20 = vld [vmem:[%s1478_s0 + $0x8] sm:$0xff]  ;;  %v18_v21 = vld [vmem:[%s1478_s0] sm:$0xff]  ;;  %vm82_vm4 = vcmask 908288   ;;  %vm109_vm5 = vcmask 64512  }
   0x7   :  { %v52_v9 = vand.u32 15, %v40_v7  ;;  %vm65_vm0 = vcmp.gt.s32.totalorder %v45_v8, 0  ;;  %vm69_vm1 = vcmp.lt.s32.totalorder %v45_v8, 15  ;;  %s1248_s22 = smov 127   ;;  %s1249_s23 = smov 17   ;;  %v1113_v37 = vld [vmem:[%s1480_s2 + $0x40] sm:$0xff] }
   0x8   :  { %v67_v10 = vsel %vm65_vm0, 1.0, %v1243_v4  ;;  %v71_v11 = vsel %vm69_vm1, 1.0, %v1243_v4  ;;  %s1250_s24 = smov 16   ;;  %vm432_vm6 = vcmask 7168   ;;  %vm296_vm7 = vcmask 924672   ;;  %v1099_v59 = vld [vmem:[%s1480_s2 + $0x10] sm:$0xff] }
   0x9   :  { %vm66_vm2 = vcmp.gt.s32.totalorder %v52_v9, 0  ;;  %vm70_vm3 = vcmp.lt.s32.totalorder %v52_v9, 15  ;;  %vm104_vm8 = vcmask 130048   ;;  %vm316_vm9 = vcmask 121856   ;;  %v1100_v0 = vld [vmem:[%s1480_s2 + $0x18] sm:$0xff]  ;;  %s1251_s8 = smov 112  }
   0xa   :  { %v68_v12 = vsel %vm66_vm2, 1.0, %v1243_v4  ;;  %v72_v13 = vsel %vm70_vm3, 1.0, %v1243_v4  ;;  %vm412_vm10 = vcmask 1039360   ;;  %vm202_vm11 = vcmask 138240  }
   0xb   :  { %v1179_v14 = vpack.i.bf16 %v68_v12, %v67_v10  ;;  %v1189_v15 = vpack.i.bf16 %v72_v13, %v71_v11  ;;  %v1252_v13 = vmov 0   ;;  %vm857_vm12 = vcmask 916480  }
   0xc   :  { %1209 = vset.pattern.permute.xlu0 %v1252_v13  ;;  %1210 = vset.pattern.permute.xlu1 %v1252_v13 }
   0xd   :  { %1180 = vrot.lane.b32.xlu0 %v1179_v14, %s1244_s1  ;;  %1190 = vrot.lane.b32.xlu1 %v1189_v15, %s1245_s19 }
   0xe   :  { %v1212_v16 = vpop.eup %1211 }
   0xf   :  { %v1214_v17 = vpop.eup %1213  ;;  %v27_v18 = vadd.f32 1.0, %v1212_v16 }
  0x10   :  { %v26_v19 = vadd.f32 1.0, %v1214_v17 }
  0x11   :  { %1185 = vrot.lane.b32.xlu0 %v1189_v15, %s1246_s20  ;;  %1195 = vrot.lane.b32.xlu1 %v1179_v14, %s1247_s21  ;;  %1215 = vrcp.f32 %v27_v18 }
  0x12   :  { %1217 = vrcp.f32 %v26_v19 }
  0x15   :  { %1200 = vrot.lane.b32.xlu0 %v1179_v14, %s1248_s22  ;;  %1205 = vrot.lane.b32.xlu1 %v1189_v15, %s1249_s23  ;;  %v1063_v14 = vld [vmem:[%s1481_s3] sm:$0xff]  ;;  %v1064_v15 = vld [vmem:[%s1481_s3 + $0x8] sm:$0xff]  ;;  %s1253_s3 = smov [#allocation3]  }
  0x19   :  { %98 = vrot.lane.b32.xlu0 %v1243_v4, %s1250_s24 }
  0x1b   :  { %v1216_v22 = vpop.eup %1215 }
  0x1c   :  { %v1218_v23 = vpop.eup %1217  ;;  %v1306_v24 = vmul.f32 %v1216_v22, %v19_v20 }
  0x1d   :  { %v1308_v25 = vmul.f32 %v1218_v23, %v18_v21 }
  0x1e   :  { %102 = vrot.lane.b32.xlu1 %v1306_v24, %s1250_s24  ;;  %533 = vmatprep.subr.mxu0 %v1306_v24 }
  0x1f   :  { %100 = vrot.lane.b32.xlu0 %v1308_v25, %s1250_s24  ;;  %534 = vmatpush1.msra.mxu0 %v1308_v25 }
  0x20   :  { %1115 = vmatmul.mubr.msk.f32.vlgmr.msra.gmra.mrb[0].mxu0 %vm109_vm5, %v1113_v37  ;;  %v1105_v37 = vld [vmem:[%s1480_s2 + $0x20] sm:$0xff] }
  0x21   :  { %714 = vmatprep.mubr.f32.mxu0 %v1243_v4 }
  0x7f   :  { %v1181_v26 = vpop.permute.xlu0 %1180  ;;  %v1191_v27 = vpop.permute.xlu1 %1190 }
  0x80   :  { %v1182_v28 = vunpack.i.l.bf16 %v1181_v26  ;;  %v1192_v29 = vunpack.i.l.bf16 %v1191_v27  ;;  %v1183_v31 = vunpack.i.h.bf16 %v1181_v26  ;;  %v1193_v44 = vunpack.i.h.bf16 %v1191_v27  ;;  %v90_v26 = vld [vmem:[%s1480_s2] sm:$0xff] }
  0x82   :  { %v87_v30 = vmul.f32 0.0, %v1182_v28  ;;  %v301_v34 = vmul.f32 0.0, %v1192_v29  ;;  %v83_v40 = vsel %vm82_vm4, %v1182_v28, %v1183_v31  ;;  %v89_v48 = vmul.f32 %v1183_v31, %v1306_v24  ;;  %v91_v31 = vld [vmem:[%s1480_s2 + $0x8] sm:$0xff] }
  0x83   :  { %v1186_v32 = vpop.permute.xlu0 %1185  ;;  %v1196_v33 = vpop.permute.xlu1 %1195  ;;  %v88_v43 = vmul.f32 %v83_v40, %v1308_v25  ;;  %v297_v51 = vsel %vm296_vm7, %v1192_v29, %v1193_v44  ;;  %v303_v62 = vmul.f32 %v1193_v44, %v1306_v24  ;;  %v1121_v44 = vld [vmem:[%s1480_s2 + $0x60] sm:$0xff] }
  0x84   :  { %v1187_v35 = vunpack.i.l.bf16 %v1186_v32  ;;  %196 = vrot.lane.b32.xlu1 %v87_v30, %s1249_s23  ;;  %v1197_v36 = vunpack.i.l.bf16 %v1196_v33  ;;  %v1188_v39 = vunpack.i.h.bf16 %v1186_v32  ;;  %v1198_v50 = vunpack.i.h.bf16 %v1196_v33  ;;  %v1117_v32 = vld [vmem:[%s1480_s2 + $0x50] sm:$0xff] }
  0x85   :  { %v302_v55 = vmul.f32 %v297_v51, %v1308_v25 }
  0x86   :  { %v625_v38 = vmul.f32 %v1187_v35, %v1308_v25  ;;  %v739_v42 = vmul.f32 %v1197_v36, %v1308_v25  ;;  %v621_v45 = vsel %vm432_vm6, %v1187_v35, %v1188_v39  ;;  %v627_v54 = vmul.f32 0.0, %v1188_v39 }
  0x87   :  { %v1201_v41 = vpop.permute.xlu0 %1200  ;;  %v1206_v47 = vpop.permute.xlu1 %1205  ;;  %v626_v49 = vmul.f32 %v621_v45, %v1306_v24  ;;  %v735_v58 = vsel %vm316_vm9, %v1197_v36, %v1198_v50  ;;  %v741_v2 = vmul.f32 0.0, %v1198_v50 }
  0x88   :  { %310 = vrot.lane.b32.xlu1 %v301_v34, %s1247_s21  ;;  %634 = vrot.lane.b32.xlu0 %v625_v38, %s1248_s22  ;;  %v1203_v60 = vunpack.i.h.bf16 %v1201_v41  ;;  %v1202_v61 = vunpack.i.l.bf16 %v1201_v41  ;;  %v740_v63 = vmul.f32 %v735_v58, %v1306_v24  ;;  %v1208_v6 = vunpack.i.h.bf16 %v1206_v47  ;;  %v1118_v38 = vld [vmem:[%s1480_s2 + $0x58] sm:$0xff]  ;;  %v1125_v58 = vld [vmem:[%s1480_s2 + $0x70] sm:$0xff] }
  0x89   :  { %v1207_v7 = vunpack.i.l.bf16 %v1206_v47 }
  0x8a   :  { %v413_v1 = vsel %vm412_vm10, %v1202_v61, %v1203_v60  ;;  %v419_v3 = vmul.f32 %v1203_v60, %v1306_v24  ;;  %v417_v9 = vmul.f32 0.0, %v1202_v61  ;;  %v959_v11 = vmul.f32 0.0, %v1208_v6  ;;  %v1126_v61 = vld [vmem:[%s1480_s2 + $0x78] sm:$0xff] }
  0x8b   :  { %v99_v46 = vpop.permute.xlu0 %98  ;;  %v418_v5 = vmul.f32 %v413_v1, %v1308_v25  ;;  %v953_v8 = vsel %vm202_vm11, %v1207_v7, %v1208_v6  ;;  %v957_v12 = vmul.f32 %v1207_v7, %v1308_v25  ;;  %v1130_v1 = vld [vmem:[%s1480_s2 + $0x88] sm:$0xff] }
  0x8c   :  { %748 = vrot.lane.b32.xlu0 %v739_v42, %s1245_s19  ;;  %198 = vrot.lane.b32.xlu1 %v88_v43, %s1249_s23  ;;  %v958_v10 = vmul.f32 %v953_v8, %v1306_v24  ;;  %v1106_v43 = vld [vmem:[%s1480_s2 + $0x28] sm:$0xff] }
  0x90   :  { %200 = vrot.lane.b32.xlu0 %v89_v48, %s1249_s23  ;;  %636 = vrot.lane.b32.xlu1 %v626_v49, %s1248_s22  ;;  %v103_v52 = vpop.permute.xlu1 %102  ;;  %v1122_v49 = vld [vmem:[%s1480_s2 + $0x68] sm:$0xff] }
  0x91   :  { %v101_v53 = vpop.permute.xlu0 %100 }
  0x92   :  { %v106_v56 = vsel %vm104_vm8, %v101_v53, %v103_v52  ;;  %v105_v57 = vsel %vm104_vm8, %v99_v46, %v101_v53  ;;  %v1109_v52 = vld [vmem:[%s1480_s2 + $0x30] sm:$0xff] }
  0x93   :  { %116 = vmatprep.subr.mxu1 %v106_v56 }
  0x94   :  { %638 = vrot.lane.b32.xlu0 %v627_v54, %s1248_s22  ;;  %312 = vrot.lane.b32.xlu1 %v302_v55, %s1247_s21 }
  0x95   :  { %117 = vmatpush1.msra.mxu1 %v105_v57  ;;  %v1110_v57 = vld [vmem:[%s1480_s2 + $0x38] sm:$0xff] }
  0x96   :  { %1101 = vmatmul.mubr.msk.f32.vlgmr.msra.gmra.mrb[0].mxu1 %vm109_vm5, %v1099_v59 }
  0x97   :  { %186 = vmatprep.mubr.f32.mxu1 %v1243_v4 }
  0x98   :  { %314 = vrot.lane.b32.xlu0 %v303_v62, %s1247_s21  ;;  %750 = vrot.lane.b32.xlu1 %v740_v63, %s1245_s19  ;;  %v1114_v63 = vld [vmem:[%s1480_s2 + $0x48] sm:$0xff] }
  0x9a   :  { %1102 = vmatmul.mubr.msk.f32.gmra.mrb[2].mxu1 %vm109_vm5, %v1100_v0  ;;  %v1129_v0 = vld [vmem:[%s1480_s2 + $0x80] sm:$0xff]  ;;  %s1088_s2 = sshll.u32 %s1253_s3, 4  ;;  %s1089_s2 = int_to_ptr.vmem [resolvable:$true] %s1088_s2 }
  0x9b   :  { %277 = vmatprep.mubr.f32.mxu1 %v1243_v4  ;;  %s1219_s15 = scalar_lea.vmem %s1089_s2, 512  ;;  %p1224_p1 = scmp.lt.s32.totalorder %s1089_s2, %s1089_s2 }
  0x9c   :  { %752 = vrot.lane.b32.xlu0 %v741_v2, %s1245_s19  ;;  %853 = vrot.lane.b32.xlu1 %v1306_v24, %s1251_s8  ;;  %p1220_p0 = scmp.ne.s32.totalorder %s1089_s2, %s1219_s15  ;;  %p1225_p2 = scmp.lt.s32.totalorder %s1219_s15, %s1219_s15 }
  0x9e   :  { %p1226_p3 = por %p1225_p2, %p1224_p1 }
  0xa0   :  { %430 = vrot.lane.b32.xlu0 %v419_v3, %s1246_s20  ;;  %428 = vrot.lane.b32.xlu1 %v418_v5, %s1246_s20  ;;  %p1227_p4 = pnand %p1226_p3, %p1220_p0 }
  0xa4   :  { %855 = vrot.lane.b32.xlu0 %v1243_v4, %s1251_s8  ;;  %426 = vrot.lane.b32.xlu1 %v417_v9, %s1246_s20 }
  0xa8   :  { %851 = vrot.lane.b32.xlu0 %v1308_v25, %s1251_s8  ;;  %968 = vrot.lane.b32.xlu1 %v958_v10, %s1244_s1 }
  0xac   :  { %970 = vrot.lane.b32.xlu0 %v959_v11, %s1244_s1  ;;  %966 = vrot.lane.b32.xlu1 %v957_v12, %s1244_s1 }
  0xb0   :  { %1067 = vperm.xlu0 %1209, %v1063_v14   ;;  %1072 = vperm.xlu1 %1210, %v1064_v15  }
  0xf6   :  { %v197_v16 = vpop.permute.xlu1 %196 }
  0xfa   :  { %v311_v17 = vpop.permute.xlu1 %310  ;;  %v635_v18 = vpop.permute.xlu0 %634 }
  0xfe   :  { %v749_v19 = vpop.permute.xlu0 %748  ;;  %v199_v20 = vpop.permute.xlu1 %198 }
  0xff   :  { %v203_v27 = vsel %vm202_vm11, %v197_v16, %v199_v20 }
 0x102   :  { %v201_v21 = vpop.permute.xlu0 %200  ;;  %v637_v22 = vpop.permute.xlu1 %636 }
 0x103   :  { %v204_v23 = vsel %vm202_vm11, %v199_v20, %v201_v21  ;;  %v640_v33 = vsel %vm412_vm10, %v635_v18, %v637_v22 }
 0x104   :  { %213 = vmatprep.subr.mxu1 %v204_v23 }
 0x105   :  { %214 = vmatpush1.msra.mxu1 %v203_v27 }
 0x106   :  { %v639_v28 = vpop.permute.xlu0 %638  ;;  %v313_v29 = vpop.permute.xlu1 %312  ;;  %1103 = vmatmul.mubr.msk.f32.vlgmr.msra.gmra.mrb[0].mxu1 %vm109_vm5, %v90_v26 }
 0x107   :  { %v641_v30 = vsel %vm412_vm10, %v637_v22, %v639_v28  ;;  %283 = vmatprep.mubr.f32.mxu1 %v1243_v4  ;;  %v317_v39 = vsel %vm316_vm9, %v311_v17, %v313_v29 }
 0x108   :  { %650 = vmatprep.subr.mxu0 %v641_v30 }
 0x109   :  { %651 = vmatpush1.msra.mxu0 %v640_v33 }
 0x10a   :  { %v315_v34 = vpop.permute.xlu0 %314  ;;  %v751_v35 = vpop.permute.xlu1 %750  ;;  %1104 = vmatmul.mubr.msk.f32.gmra.mrb[2].mxu1 %vm109_vm5, %v91_v31  ;;  %1119 = vmatmul.mubr.msk.f32.vlgmr.msra.gmra.mrb[0].mxu0 %vm109_vm5, %v1117_v32 }
 0x10b   :  { %v318_v36 = vsel %vm316_vm9, %v313_v29, %v315_v34  ;;  %391 = vmatprep.mubr.f32.mxu1 %v1243_v4  ;;  %720 = vmatprep.mubr.f32.mxu0 %v1243_v4  ;;  %v754_v45 = vsel %vm296_vm7, %v749_v19, %v751_v35 }
 0x10c   :  { %327 = vmatprep.subr.mxu1 %v318_v36 }
 0x10d   :  { %328 = vmatpush1.msra.mxu1 %v317_v39 }
 0x10e   :  { %v753_v40 = vpop.permute.xlu0 %752  ;;  %v854_v41 = vpop.permute.xlu1 %853  ;;  %1107 = vmatmul.mubr.msk.f32.vlgmr.msra.gmra.mrb[0].mxu1 %vm109_vm5, %v1105_v37  ;;  %1120 = vmatmul.mubr.msk.f32.gmra.mrb[2].mxu0 %vm109_vm5, %v1118_v38 }
 0x10f   :  { %v755_v42 = vsel %vm296_vm7, %v751_v35, %v753_v40  ;;  %397 = vmatprep.mubr.f32.mxu1 %v1243_v4  ;;  %828 = vmatprep.mubr.f32.mxu0 %v1243_v4 }
 0x110   :  { %764 = vmatprep.subr.mxu0 %v755_v42 }
 0x111   :  { %765 = vmatpush1.msra.mxu0 %v754_v45 }
 0x112   :  { %v431_v46 = vpop.permute.xlu0 %430  ;;  %v429_v47 = vpop.permute.xlu1 %428  ;;  %1108 = vmatmul.mubr.msk.f32.gmra.mrb[2].mxu1 %vm109_vm5, %v1106_v43  ;;  %1123 = vmatmul.mubr.msk.f32.vlgmr.msra.gmra.mrb[0].mxu0 %vm109_vm5, %v1121_v44 }
 0x113   :  { %v434_v48 = vsel %vm432_vm6, %v429_v47, %v431_v46  ;;  %507 = vmatprep.mubr.f32.mxu1 %v1243_v4  ;;  %834 = vmatprep.mubr.f32.mxu0 %v1243_v4 }
 0x114   :  { %443 = vmatprep.subr.mxu1 %v434_v48 }
 0x116   :  { %v856_v50 = vpop.permute.xlu0 %855  ;;  %v427_v51 = vpop.permute.xlu1 %426  ;;  %1124 = vmatmul.mubr.msk.f32.gmra.mrb[2].mxu0 %vm109_vm5, %v1122_v49 }
 0x117   :  { %v433_v53 = vsel %vm432_vm6, %v427_v51, %v429_v47  ;;  %v859_v54 = vsel %vm857_vm12, %v854_v41, %v856_v50  ;;  %932 = vmatprep.mubr.f32.mxu0 %v1243_v4 }
 0x118   :  { %444 = vmatpush1.msra.mxu1 %v433_v53  ;;  %868 = vmatprep.subr.mxu0 %v859_v54 }
 0x119   :  { %1111 = vmatmul.mubr.msk.f32.vlgmr.msra.gmra.mrb[0].mxu1 %vm109_vm5, %v1109_v52  ;;  %1133 = vmatprep.subr.mxu1 %v1306_v24 }
 0x11a   :  { %v852_v55 = vpop.permute.xlu0 %851  ;;  %v969_v56 = vpop.permute.xlu1 %968  ;;  %513 = vmatprep.mubr.f32.mxu1 %v1243_v4  ;;  %1134 = vmatpush1.msra.mxu1 %v1308_v25 }
 0x11b   :  { %v858_v59 = vsel %vm857_vm12, %v852_v55, %v854_v41 }
 0x11c   :  { %869 = vmatpush1.msra.mxu0 %v858_v59 }
 0x11d   :  { %1112 = vmatmul.mubr.msk.f32.gmra.mrb[2].mxu1 %vm109_vm5, %v1110_v57  ;;  %1127 = vmatmul.mubr.msk.f32.vlgmr.msra.gmra.mrb[0].mxu0 %vm109_vm5, %v1125_v58 }
 0x11e   :  { %v971_v24 = vpop.permute.xlu0 %970  ;;  %v967_v60 = vpop.permute.xlu1 %966  ;;  %938 = vmatprep.mubr.f32.mxu0 %v1243_v4  ;;  %603 = vmatprep.mubr.f32.mxu1 %v1243_v4 }
 0x11f   :  { %v972_v62 = vsel %vm82_vm4, %v967_v60, %v969_v56  ;;  %v973_v25 = vsel %vm82_vm4, %v969_v56, %v971_v24 }
 0x120   :  { %982 = vmatprep.subr.mxu0 %v973_v25 }
 0x121   :  { %1128 = vmatmul.mubr.msk.f32.gmra.mrb[2].mxu0 %vm109_vm5, %v1126_v61 }
 0x122   :  { %983 = vmatpush1.msra.mxu0 %v972_v62  ;;  %1046 = vmatprep.mubr.f32.mxu0 %v1243_v4 }
 0x125   :  { %1116 = vmatmul.mubr.msk.f32.vlgmr.msra.gmra.mrb[2].mxu1 %vm109_vm5, %v1114_v63  ;;  %1131 = vmatmul.mubr.msk.f32.vlgmr.msra.gmra.mrb[0].mxu0 %vm109_vm5, %v1129_v0 }
 0x126   :  { %1052 = vmatprep.mubr.f32.mxu0 %v1243_v4 }
 0x129   :  { %1132 = vmatmul.mubr.msk.f32.gmra.mrb[2].mxu0 %vm109_vm5, %v1130_v1 }
 0x12f   :  { %v1068_v5 = vpop.permute.xlu0 %1067  ;;  %v1073_v15 = vpop.permute.xlu1 %1072 }
 0x1ec   :  { %v509_v2 = vpop.f32.mrb[0].mxu1 }
 0x1ed   :  { %v511_v3 = vpop.f32.mrb[1].mxu1 }
 0x1f8   :  { %v605_v6 = vpop.f32.mrb[2].mxu1  ;;  %v1048_v7 = vpop.f32.mrb[0].mxu0 }
 0x1f9   :  { %v1135_v8 = vadd.f32 %v1048_v7, %v509_v2  ;;  %v607_v9 = vpop.f32.mrb[3].mxu1  ;;  %v1050_v10 = vpop.f32.mrb[1].mxu0 }
 0x1fa   :  { %v1136_v11 = vadd.f32 %v1050_v10, %v511_v3 }
 0x1fb   :  { %v1075_v12 = vadd.f32 %v1135_v8, %v1068_v5 }
 0x1fc   :  { %v1076_v13 = vadd.f32 %v1136_v11, %v1068_v5  ;;  %v1054_v14 = vpop.f32.mrb[2].mxu0 }
 0x1fd   :  { %1079 = vst [vmem:[#allocation3] sm:$0xff] %v1075_v12  ;;  %v1137_v4 = vadd.f32 %v1054_v14, %v605_v6  ;;  %v1056_v16 = vpop.f32.mrb[3].mxu0 }
 0x1fe   :  { %1080 = vst [vmem:[#allocation3 + $0x8] sm:$0xff] %v1076_v13  ;;  %v1138_v17 = vadd.f32 %v1056_v16, %v607_v9 }
 0x1ff   :  { %v1077_v18 = vadd.f32 %v1137_v4, %v1073_v15 }
 0x200   :  { %v1078_v19 = vadd.f32 %v1138_v17, %v1073_v15 }
 0x201   :  { %1081 = vst [vmem:[#allocation3 + $0x10] sm:$0xff] %v1077_v18 }
 0x202   :  { %1082 = vst [vmem:[#allocation3 + $0x18] sm:$0xff] %v1078_v19 }
 0x203   :  { %1230 = shalt.err (!%p1227_p4)
}
 0x204   :  { %s1231_s18 = scalar_lea.hbm %s1482_s4, 512 }
 0x205   :  { %p1232_p5 = scmp.ne.s32.totalorder %s1482_s4, %s1231_s18  ;;  %p1235_p6 = scmp.lt.u32.totalorder %s1231_s18, %s1482_s4 }
 0x207   :  { %p1237_p7 = pnand %p1235_p6, %p1232_p5 }
 0x209   :  { %1240 = shalt.err (!%p1237_p7)
}
 0x20a   :  { %s1254_s22 = smov 256  }
 0x20b   :  { %1094 = dma.vmem_to_hbm [thread:$0]  %s1089_s2, 512, %s1482_s4, [#allocation4], %s1254_s22, %s1254_s22, %s1250_s24  }
 0x20c   :  { %1241 = dma.done.wait [#allocation4], 512  }
 0x20d   :  { %1242 = vsyncadd [#allocation4], 4294966784 }
 0x20e   :  { %1098 = vsyncpa [#allocation4], 1 }

</bundles_post_ra>
